<compile_context>
chip_gen: v7x
topology: tpu7x:2x2x1
jax: 0.10.0
libtpu: 0.0.40
codegen_flags: <defaults>
</compile_context>

<pallas_src>
import functools

import jax
import jax.numpy as jnp
from jax.experimental import pallas as pl
from jax.experimental.pallas import tpu as pltpu


# ---------------------------------------------------------------------------
# Helpers
# ---------------------------------------------------------------------------
def _round_up(x, m):
    return ((x + m - 1) // m) * m


def _sublane_pack(itemsize):
    # sublane packing: f32 -> 8, bf16/f16 -> 16, int8/fp8 -> 32
    return {4: 8, 2: 16, 1: 32}.get(itemsize, 8)


def _padded_block_bytes(bc, h, w, itemsize):
    """VMEM footprint of one (bc, h, w) block after (sublane, 128) padding."""
    sub = _sublane_pack(itemsize)
    return bc * _round_up(max(h, 1), sub) * _round_up(max(w, 1), 128) * itemsize


def _pick_h_tile(H, W, itemsize, budget):
    """h-tile: full H if it fits the per-buffer budget, else a multiple of the
    sublane pack; prefer a divisor of H so the last block needs no masking."""
    sub = _sublane_pack(itemsize)
    if _padded_block_bytes(1, H, W, itemsize) <= budget:
        return H
    row_bytes = _round_up(W, 128) * itemsize
    h = max(sub, (budget // (row_bytes * sub)) * sub)
    if h >= H:
        return H
    for cand in range(h, sub - 1, -sub):      # largest divisor of H <= h
        if H % cand == 0:
            return cand
    return h                                   # non-dividing: masked last block


def _pick_bc_tile(BC, plane_bytes, budget, num_h):
    """bc-tile: divisor of B*C fitting the budget; prefer an even number of
    bc-blocks (v7x megacore) and >= 4 total grid blocks (pipelining)."""
    cap = max(1, budget // max(1, plane_bytes))
    divisors = sorted((t for t in range(1, BC + 1) if BC % t == 0 and t <= cap),
                      reverse=True)
    for t in divisors:
        if (BC // t) % 2 == 0 and (BC // t) * num_h >= 4:
            return t
    for t in divisors:
        if (BC // t) * num_h >= 4:
            return t
    return divisors[0]


# ---------------------------------------------------------------------------
# Kernel
# ---------------------------------------------------------------------------
def _partial_sums_kernel(pred_ref, target_ref, out_ref, prev_row_ref, *,
                         H, h_tile, multi_h, needs_mask, native_diff):
    """Per-(bc, h)-block partial sums, accumulated over the h grid axis.

    Lane layout of the (1, 8, 128) output tile (values replicated across
    sublanes; the wrapper reads sublane 0):
      lane 0: sum |d|, lane 1: sum d^2, lane 2: sum |dx(d)|, lane 3: sum |dy(d)|
    with d = pred - target.
    """
    j = pl.program_id(1)                       # h-block index (innermost axis)

    p = pred_ref[...]
    t = target_ref[...]
    if native_diff:
        # bf16 subtract on the native bf16 VALU (v6e/v7x): one convert per
        # element pair instead of two. Tiny numeric deviation vs f32 subtract.
        d = (p - t).astype(jnp.float32)
    else:
        d = p.astype(jnp.float32) - t.astype(jnp.float32)
    # d: (bc_tile, h_tile, W) f32

    if needs_mask:
        # Last h-block may be partial: zero the padded rows (their VMEM
        # content is stale; the select discards it).
        rows_left = H - j * h_tile
        row = jax.lax.broadcasted_iota(jnp.int32, d.shape, 1)
        d = jnp.where(row < rows_left, d, 0.0)

    # ---- L1 / MSE partial sums (padded rows contribute exactly 0) ----------
    l1_sum = jnp.sum(jnp.abs(d))
    sq_sum = jnp.sum(d * d)

    # ---- x-gradient: full-width XLU roll + lane mask (no 1-wide slices) ----
    # pltpu.roll follows jnp.roll semantics: rolled[..., w] = d[..., w-1], so
    # lane 0 holds the circular-wrap diff and is masked out.
    rolled = pltpu.roll(d, shift=1, axis=2)
    lane = jax.lax.broadcasted_iota(jnp.int32, d.shape, 2)
    gx_sum = jnp.sum(jnp.where(lane >= 1, jnp.abs(rolled - d), 0.0))

    # ---- y-gradient: in-block rows + boundary row from previous h-block ----
    if h_tile > 1:
        dy = jnp.abs(d[:, 1:, :] - d[:, :-1, :])
        if needs_mask:
            dy = jnp.where(row[:, 1:, :] < rows_left, dy, 0.0)
        gy_sum = jnp.sum(dy)
    else:
        gy_sum = jnp.float32(0.0)
    if multi_h:
        boundary = jnp.sum(jnp.abs(d[:, 0:1, :] - prev_row_ref[...]))
        gy_sum = gy_sum + jnp.where(j > 0, boundary, 0.0)
        prev_row_ref[...] = d[:, h_tile - 1:h_tile, :]

    # ---- lane-dense per-block partials: one (1, 8, 128) f32 tile -----------
    lane128 = jax.lax.broadcasted_iota(jnp.int32, (1, 8, 128), 2)
    tile = jnp.where(lane128 == 0, l1_sum,
           jnp.where(lane128 == 1, sq_sum,
           jnp.where(lane128 == 2, gx_sum,
           jnp.where(lane128 == 3, gy_sum, 0.0)))).astype(jnp.float32)

    @pl.when(j == 0)
    def _():
        out_ref[...] = tile

    @pl.when(j > 0)
    def _():
        out_ref[...] = out_ref[...] + tile


# ---------------------------------------------------------------------------
# Wrapper
# ---------------------------------------------------------------------------
def weather_loss(pred, target,
                 l1_weight=0.4, spectral_weight=0.3,
                 mse_weight=0.2, gradient_weight=0.1,
                 weight_high_freq=2.0,
                 bc_tile=None, h_tile=None,
                 native_diff=None):
    """Pallas implementation of WeatherLoss.forward (NCHW inputs)."""
    B, C, H, W = pred.shape
    BC = B * C
    itemsize = pred.dtype.itemsize

    # ---- generation-aware VMEM budgeting ------------------------------------
    try:
        vmem_cap = int(pltpu.get_tpu_info().vmem_capacity_bytes)
    except Exception:
        vmem_cap = 64 * 1024 * 1024            # conservative (v7x per-TC) fallback
    per_buf_budget = vmem_cap // 16            # ~8 MiB v5e/v6e, ~4 MiB v7x

    if h_tile is None:
        h_tile = _pick_h_tile(H, W, itemsize, per_buf_budget)
    num_h = (H + h_tile - 1) // h_tile
    needs_mask = (H % h_tile != 0)
    plane_bytes = _padded_block_bytes(1, h_tile, W, itemsize)
    if bc_tile is None:
        bc_tile = _pick_bc_tile(BC, plane_bytes, per_buf_budget, num_h)
    assert BC % bc_tile == 0, "bc_tile must divide B*C"
    num_bc = BC // bc_tile

    if native_diff is None:
        # Enable the bf16 subtract only for bf16 inputs (assumes v6e/v7x bf16
        # VALU; pass native_diff=False on v5e or for bit-exact f32 subtraction).
        native_diff = (pred.dtype == jnp.bfloat16)

    # vmem_limit derived from the actual block footprint (2 inputs x 2 buffers
    # + output + carry-row scratch), with slack, capped to physical VMEM.
    block_bytes = _padded_block_bytes(bc_tile, h_tile, W, itemsize)
    vmem_needed = (4 * block_bytes + 2 * (8 * 128 * 4)
                   + _padded_block_bytes(bc_tile, 1, W, 4))
    vmem_limit = int(min(max(2 * vmem_needed, 16 << 20), int(0.85 * vmem_cap)))
    vmem_limit = max(vmem_limit, min(vmem_needed + (2 << 20), vmem_cap))

    # Native dtype into the kernel (no wrapper upcast); reshape is free.
    p_bc = pred.reshape(BC, H, W)
    t_bc = target.reshape(BC, H, W)

    kernel = functools.partial(
        _partial_sums_kernel, H=H, h_tile=h_tile, multi_h=(num_h > 1),
        needs_mask=needs_mask, native_diff=native_diff)

    n_elem = BC * H * W
    cost = pl.CostEstimate(
        flops=int(12 * n_elem),
        transcendentals=0,
        bytes_accessed=int(2 * n_elem * itemsize + num_bc * 8 * 128 * 4))

    partials = pl.pallas_call(
        kernel,
        out_shape=jax.ShapeDtypeStruct((num_bc, 8, 128), jnp.float32),
        grid_spec=pltpu.PrefetchScalarGridSpec(
            num_scalar_prefetch=0,
            grid=(num_bc, num_h),
            in_specs=[pl.BlockSpec((bc_tile, h_tile, W), lambda i, j: (i, j, 0)),
                      pl.BlockSpec((bc_tile, h_tile, W), lambda i, j: (i, j, 0))],
            out_specs=pl.BlockSpec((1, 8, 128), lambda i, j: (i, 0, 0)),
            scratch_shapes=[pltpu.VMEM((bc_tile, 1, W), jnp.float32)]),
        compiler_params=pltpu.CompilerParams(
            dimension_semantics=("parallel", "arbitrary"),
            vmem_limit_bytes=vmem_limit),
        cost_estimate=cost,
    )(p_bc, t_bc)

    # Tiny cross-block reduce in JAX (read sublane 0 of each lane-dense tile).
    sums = jnp.sum(partials[:, 0, :], axis=0)                    # (128,)
    l1 = sums[0] / n_elem
    mse = sums[1] / n_elem
    # Note: W == 1 or H == 1 divides by zero (reference's empty-mean NaN too).
    grad = sums[2] / (BC * H * (W - 1)) + sums[3] / (BC * (H - 1) * W)

    # ---- Spectral loss (plain JAX; fuses with the FFT epilogue) ------------
    pf = pred if pred.dtype == jnp.float32 else pred.astype(jnp.float32)
    tf = target if target.dtype == jnp.float32 else target.astype(jnp.float32)
    pred_mag = jnp.abs(jnp.fft.rfft2(pf, norm='ortho'))
    target_mag = jnp.abs(jnp.fft.rfft2(tf, norm='ortho'))
    fy = jnp.fft.fftfreq(H).reshape(-1, 1)
    fx = jnp.fft.rfftfreq(W).reshape(1, -1)
    freq_grid = jnp.sqrt(fy ** 2 + fx ** 2)
    freq_weight = (1.0 + (weight_high_freq - 1.0) * freq_grid).astype(jnp.float32)
    spec = jnp.mean(freq_weight[None, None, :, :] * jnp.abs(pred_mag - target_mag))

    total = (l1_weight * l1 + spectral_weight * spec
             + mse_weight * mse + gradient_weight * grad)
    return total, {'l1': l1, 'mse': mse, 'spectral': spec,
                   'gradient': grad, 'total': total}


# ---------------------------------------------------------------------------
# Pure-JAX reference (mirrors the PyTorch module)
# ---------------------------------------------------------------------------
def _weather_loss_ref(pred, target,
                      l1_weight=0.4, spectral_weight=0.3,
                      mse_weight=0.2, gradient_weight=0.1,
                      weight_high_freq=2.0):
    pred = pred.astype(jnp.float32)
    target = target.astype(jnp.float32)
    l1 = jnp.mean(jnp.abs(pred - target))
    mse = jnp.mean((pred - target) ** 2)

    pdx = pred[..., :, 1:] - pred[..., :, :-1]
    tdx = target[..., :, 1:] - target[..., :, :-1]
    pdy = pred[..., 1:, :] - pred[..., :-1, :]
    tdy = target[..., 1:, :] - target[..., :-1, :]
    grad = jnp.mean(jnp.abs(pdx - tdx)) + jnp.mean(jnp.abs(pdy - tdy))

    pmag = jnp.abs(jnp.fft.rfft2(pred, norm='ortho'))
    tmag = jnp.abs(jnp.fft.rfft2(target, norm='ortho'))
    fy = jnp.fft.fftfreq(pred.shape[-2]).reshape(-1, 1)
    fx = jnp.fft.rfftfreq(pred.shape[-1]).reshape(1, -1)
    fw = 1.0 + (weight_high_freq - 1.0) * jnp.sqrt(fy ** 2 + fx ** 2)
    spec = jnp.mean(fw[None, None] * jnp.abs(pmag - tmag))

    total = (l1_weight * l1 + spectral_weight * spec
             + mse_weight * mse + gradient_weight * grad)
    return total, {'l1': l1, 'mse': mse, 'spectral': spec,
                   'gradient': grad, 'total': total}


# ---------------------------------------------------------------------------
# Self-test
# ---------------------------------------------------------------------------
def _check(got, ref, tag):
    for name in ("l1", "mse", "spectral", "gradient", "total"):
        assert jnp.allclose(got[name], ref[name], rtol=1e-4, atol=1e-5), (
            tag, name, got[name], ref[name])


if __name__ == "__main__":
    key = jax.random.PRNGKey(0)
    k1, k2, k3, k4 = jax.random.split(key, 4)

    # ---- shape 1: 2x4x16x16 (auto tiling -> grid (4, 1)) -------------------
    B, C, H, W = 2, 4, 16, 16
    pred = jax.random.normal(k1, (B, C, H, W), dtype=jnp.float32)
    target = jax.random.normal(k2, (B, C, H, W), dtype=jnp.float32)

    total, parts = weather_loss(pred, target)
    total = jax.block_until_ready(total)
    parts = {k: jax.block_until_ready(v) for k, v in parts.items()}
    _, ref_parts = _weather_loss_ref(pred, target)
    ref_parts = {k: jax.block_until_ready(v) for k, v in ref_parts.items()}
    assert jnp.isfinite(total), "non-finite loss"
    _check(parts, ref_parts, "auto")

    # ---- explicit H-tiling: grid (2, 2), exercises the boundary-row carry --
    total2, parts2 = weather_loss(pred, target, bc_tile=4, h_tile=8)
    parts2 = {k: jax.block_until_ready(v) for k, v in parts2.items()}
    _check(parts2, ref_parts, "h_tiled")

    # ---- non-dividing h_tile (row-mask path): H=24 with h_tile=16 ----------
    pred3 = jax.random.normal(k3, (B, C, 24, W), dtype=jnp.float32)
    target3 = jax.random.normal(k4, (B, C, 24, W), dtype=jnp.float32)
    total3, parts3 = weather_loss(pred3, target3, bc_tile=2, h_tile=16)
    parts3 = {k: jax.block_until_ready(v) for k, v in parts3.items()}
    _, ref_parts3 = _weather_loss_ref(pred3, target3)
    ref_parts3 = {k: jax.block_until_ready(v) for k, v in ref_parts3.items()}
    _check(parts3, ref_parts3, "masked_h")

    # ---- bf16 inputs: native-dtype DMA + bf16 subtract in-kernel -----------
    total_bf16, _ = weather_loss(pred.astype(jnp.bfloat16),
                                 target.astype(jnp.bfloat16))
    total_bf16 = jax.block_until_ready(total_bf16)
    assert jnp.isfinite(total_bf16), "non-finite bf16 loss"

    print("KERNEL_OK")
</pallas_src>

<mosaic_0001>
module attributes {stable_mosaic.version = 11 : i64} {
  func.func @_partial_sums_kernel(%arg0: i32, %arg1: i32, %arg2: memref<2x16x16xf32, #tpu.memory_space<vmem>>, %arg3: memref<2x16x16xf32, #tpu.memory_space<vmem>>, %arg4: memref<1x8x128xf32, #tpu.memory_space<vmem>>, %arg5: memref<2x1x16xf32, #tpu.memory_space<vmem>>) attributes {dimension_semantics = [#tpu.dimension_semantics<parallel>, #tpu.dimension_semantics<arbitrary>], iteration_bounds = array<i64: 4, 1>, scalar_prefetch = 0 : i64, scratch_operands = 1 : i64, tpu.core_type = #tpu.core_type<tc>, window_params = [{transform_indices = @transform_0, window_bounds = array<i64: 2, 16, 16>}, {transform_indices = @transform_1, window_bounds = array<i64: 2, 16, 16>}, {transform_indices = @transform_2, window_bounds = array<i64: 1, 8, 128>}]} {
    %c0 = arith.constant 0 : index
    %c0_0 = arith.constant 0 : index
    %c0_1 = arith.constant 0 : index
    %0 = vector.load %arg2[%c0, %c0_0, %c0_1] : memref<2x16x16xf32, #tpu.memory_space<vmem>>, vector<2x16x16xf32>
    %c0_2 = arith.constant 0 : index
    %c0_3 = arith.constant 0 : index
    %c0_4 = arith.constant 0 : index
    %1 = vector.load %arg3[%c0_2, %c0_3, %c0_4] : memref<2x16x16xf32, #tpu.memory_space<vmem>>, vector<2x16x16xf32>
    %2 = arith.subf %0, %1 : vector<2x16x16xf32>
    %3 = math.absf %2 : vector<2x16x16xf32>
    %4 = vector.shape_cast %3 : vector<2x16x16xf32> to vector<1x2x16x16xf32>
    %cst = arith.constant dense<0.000000e+00> : vector<1xf32>
    %5 = vector.multi_reduction <add>, %4, %cst [1, 2, 3] : vector<1x2x16x16xf32> to vector<1xf32>
    %6 = vector.shape_cast %5 : vector<1xf32> to vector<1x1x1x1xf32>
    %7 = vector.extract %6[0, 0, 0, 0] : f32 from vector<1x1x1x1xf32>
    %8 = arith.mulf %2, %2 : vector<2x16x16xf32>
    %9 = vector.shape_cast %8 : vector<2x16x16xf32> to vector<1x2x16x16xf32>
    %cst_5 = arith.constant dense<0.000000e+00> : vector<1xf32>
    %10 = vector.multi_reduction <add>, %9, %cst_5 [1, 2, 3] : vector<1x2x16x16xf32> to vector<1xf32>
    %11 = vector.shape_cast %10 : vector<1xf32> to vector<1x1x1x1xf32>
    %12 = vector.extract %11[0, 0, 0, 0] : f32 from vector<1x1x1x1xf32>
    %c1_i32 = arith.constant 1 : i32
    %13 = tpu.dynamic_rotate %2 by %c1_i32 dim 2 : vector<2x16x16xf32>, i32 -> vector<2x16x16xf32>
    %14 = tpu.iota {dimensions = array<i32: 2>} : vector<2x16x16xi32>
    %c1_i32_6 = arith.constant 1 : i32
    %15 = vector.broadcast %c1_i32_6 : i32 to vector<2x16x16xi32>
    %16 = arith.cmpi sge, %14, %15 : vector<2x16x16xi32>
    %17 = arith.subf %13, %2 : vector<2x16x16xf32>
    %18 = math.absf %17 : vector<2x16x16xf32>
    %cst_7 = arith.constant 0.000000e+00 : f32
    %19 = vector.broadcast %cst_7 : f32 to vector<2x16x16xf32>
    %20 = arith.select %16, %18, %19 : vector<2x16x16xi1>, vector<2x16x16xf32>
    %21 = vector.shape_cast %20 : vector<2x16x16xf32> to vector<1x2x16x16xf32>
    %cst_8 = arith.constant dense<0.000000e+00> : vector<1xf32>
    %22 = vector.multi_reduction <add>, %21, %cst_8 [1, 2, 3] : vector<1x2x16x16xf32> to vector<1xf32>
    %23 = vector.shape_cast %22 : vector<1xf32> to vector<1x1x1x1xf32>
    %24 = vector.extract %23[0, 0, 0, 0] : f32 from vector<1x1x1x1xf32>
    %25 = vector.extract_strided_slice %2 {offsets = [0, 1, 0], sizes = [2, 15, 16], strides = [1, 1, 1]} : vector<2x16x16xf32> to vector<2x15x16xf32>
    %26 = vector.extract_strided_slice %2 {offsets = [0, 0, 0], sizes = [2, 15, 16], strides = [1, 1, 1]} : vector<2x16x16xf32> to vector<2x15x16xf32>
    %27 = arith.subf %25, %26 : vector<2x15x16xf32>
    %28 = math.absf %27 : vector<2x15x16xf32>
    %29 = vector.shape_cast %28 : vector<2x15x16xf32> to vector<1x2x15x16xf32>
    %cst_9 = arith.constant dense<0.000000e+00> : vector<1xf32>
    %30 = vector.multi_reduction <add>, %29, %cst_9 [1, 2, 3] : vector<1x2x15x16xf32> to vector<1xf32>
    %31 = vector.shape_cast %30 : vector<1xf32> to vector<1x1x1x1xf32>
    %32 = vector.extract %31[0, 0, 0, 0] : f32 from vector<1x1x1x1xf32>
    %33 = tpu.iota {dimensions = array<i32: 2>} : vector<1x8x128xi32>
    %c0_i32 = arith.constant 0 : i32
    %34 = vector.broadcast %c0_i32 : i32 to vector<1x8x128xi32>
    %35 = arith.cmpi eq, %33, %34 : vector<1x8x128xi32>
    %c1_i32_10 = arith.constant 1 : i32
    %36 = vector.broadcast %c1_i32_10 : i32 to vector<1x8x128xi32>
    %37 = arith.cmpi eq, %33, %36 : vector<1x8x128xi32>
    %c2_i32 = arith.constant 2 : i32
    %38 = vector.broadcast %c2_i32 : i32 to vector<1x8x128xi32>
    %39 = arith.cmpi eq, %33, %38 : vector<1x8x128xi32>
    %c3_i32 = arith.constant 3 : i32
    %40 = vector.broadcast %c3_i32 : i32 to vector<1x8x128xi32>
    %41 = arith.cmpi eq, %33, %40 : vector<1x8x128xi32>
    %cst_11 = arith.constant 0.000000e+00 : f32
    %42 = vector.broadcast %32 : f32 to vector<1x8x128xf32>
    %43 = vector.broadcast %cst_11 : f32 to vector<1x8x128xf32>
    %44 = arith.select %41, %42, %43 : vector<1x8x128xi1>, vector<1x8x128xf32>
    %45 = vector.broadcast %24 : f32 to vector<1x8x128xf32>
    %46 = arith.select %39, %45, %44 : vector<1x8x128xi1>, vector<1x8x128xf32>
    %47 = vector.broadcast %12 : f32 to vector<1x8x128xf32>
    %48 = arith.select %37, %47, %46 : vector<1x8x128xi1>, vector<1x8x128xf32>
    %49 = vector.broadcast %7 : f32 to vector<1x8x128xf32>
    %50 = arith.select %35, %49, %48 : vector<1x8x128xi1>, vector<1x8x128xf32>
    %c0_i32_12 = arith.constant 0 : i32
    %51 = arith.cmpi eq, %arg1, %c0_i32_12 : i32
    %52 = arith.extui %51 : i1 to i32
    %c0_i32_13 = arith.constant 0 : i32
    %53 = arith.cmpi ne, %52, %c0_i32_13 : i32
    scf.if %53 {
      %c0_16 = arith.constant 0 : index
      %c0_17 = arith.constant 0 : index
      %c0_18 = arith.constant 0 : index
      %57 = vector.load %arg4[%c0_16, %c0_17, %c0_18] : memref<1x8x128xf32, #tpu.memory_space<vmem>>, vector<1x8x128xf32>
      tpu.vector_store %arg4[%c0_16, %c0_17, %c0_18], %50 {strides = array<i32>} : memref<1x8x128xf32, #tpu.memory_space<vmem>>, vector<1x8x128xf32>,
    } else {
    }
    %c0_i32_14 = arith.constant 0 : i32
    %54 = arith.cmpi sgt, %arg1, %c0_i32_14 : i32
    %55 = arith.extui %54 : i1 to i32
    %c0_i32_15 = arith.constant 0 : i32
    %56 = arith.cmpi ne, %55, %c0_i32_15 : i32
    scf.if %56 {
      %c0_16 = arith.constant 0 : index
      %c0_17 = arith.constant 0 : index
      %c0_18 = arith.constant 0 : index
      %57 = vector.load %arg4[%c0_16, %c0_17, %c0_18] : memref<1x8x128xf32, #tpu.memory_space<vmem>>, vector<1x8x128xf32>
      %58 = arith.addf %57, %50 : vector<1x8x128xf32>
      %c0_19 = arith.constant 0 : index
      %c0_20 = arith.constant 0 : index
      %c0_21 = arith.constant 0 : index
      %59 = vector.load %arg4[%c0_19, %c0_20, %c0_21] : memref<1x8x128xf32, #tpu.memory_space<vmem>>, vector<1x8x128xf32>
      tpu.vector_store %arg4[%c0_19, %c0_20, %c0_21], %58 {strides = array<i32>} : memref<1x8x128xf32, #tpu.memory_space<vmem>>, vector<1x8x128xf32>,
    } else {
    }
    return
  }
  func.func @transform_0(%arg0: i32, %arg1: i32) -> (i32, i32, i32) {
    %c0_i32 = arith.constant 0 : i32
    %c0_i32_0 = arith.constant 0 : i32
    return %arg0, %arg1, %c0_i32 : i32, i32, i32
  }
  func.func @transform_1(%arg0: i32, %arg1: i32) -> (i32, i32, i32) {
    %c0_i32 = arith.constant 0 : i32
    %c0_i32_0 = arith.constant 0 : i32
    return %arg0, %arg1, %c0_i32 : i32, i32, i32
  }
  func.func @transform_2(%arg0: i32, %arg1: i32) -> (i32, i32, i32) {
    %c0_i32 = arith.constant 0 : i32
    %c0_i32_0 = arith.constant 0 : i32
    %c0_i32_1 = arith.constant 0 : i32
    return %arg0, %c0_i32, %c0_i32_0 : i32, i32, i32
  }
}

</mosaic_0001>

<bundles_post_ra>
// kernel: tpu_custom_call.1
= control target key start
LH: loop header
LB: loop body
LE: loop exit
PB: predicated region body
PF: predicated region fallthrough
CT: control target
= control target key end

     0   :  { %7 = vsyncpa [#allocation4], 0  ;;  %s1156_s0 = inlined_call_operand.hbm [shape: f32[8,16,16], index: 0, kind: input, shape index: {}]   ;;  %s1157_s1 = inlined_call_operand.hbm [shape: f32[8,16,16], index: 1, kind: input, shape index: {}]   ;;  %s1158_s2 = inlined_call_operand.hbm [shape: f32[4,8,128], index: 2, kind: output, shape index: {}]  }
   0x1   :  { %9 = vsyncpa [#allocation4 + $0x1], 0 }
   0x2   :  { %10 = vsyncpa [#allocation7], 0 }
   0x3   :  { %12 = vsyncpa [#allocation7 + $0x1], 0 }
   0x4   :  { %13 = vsyncpa [#allocation5], 0 }
   0x5   :  { %15 = vsyncpa [#allocation5 + $0x1], 0  ;;  %s840_s9 = smov 0   ;;  %s842_s10 = smov 0  }
   0x6   :  { %s844_s11 = smov 0   ;;  %s846_s12 = smov 0  }
   0x7   :  { %s848_s13 = smov 0   ;;  %s850_s14 = smov 0  }
   0x8 LB: > { %s565_s15 = sadd.s32 4294967295, %s815_s14   ;;  %s566_s16 = sadd.s32 4294967294, %s815_s14   ;;  %s815_s14 = sphi %s850_s14, %s21_s14   ;;  %s811_s13 = sphi %s848_s13, %s1175_s13   ;;  %s807_s12 = sphi %s846_s12, %s1174_s12   ;;  %s803_s11 = sphi %s844_s11, %s1173_s11   ;;  %s799_s10 = sphi %s842_s10, %s1172_s10   ;;  %s795_s9 = sphi %s840_s9, %s1171_s9  }
   0x9   : > { %s33_s17 = sadd.s32 1, %s811_s13  ;;  %s42_s18 = sadd.s32 1, %s803_s11 }
   0xa   : > { %p35_p0 = scmp.ge.s32.totalorder %s33_s17, 4  ;;  %p49_p1 = scmp.ne.s32.totalorder %s803_s11, %s799_s10 }
   0xb   : > { %p50_p2 = scmp.eq.s32.totalorder %s815_s14, 0  ;;  %p55_p3 = scmp.ne.s32.totalorder %s799_s10, %s795_s9 }
   0xc   : > { %s1177_s17 = smov (%p35_p0, %s33_s17), 0  ;;  %p56_p5 = scmp.eq.s32.totalorder %s565_s15, 0 }
   0xd   : > { %p881_p4 = por %p50_p2, %p49_p1  ;;  %s37_s20 = ssub.s32 %s811_s13, %s1177_s17 }
   0xe   : > { %p107_p6 = scmp.eq.s32.totalorder %s565_s15, 3  ;;  %p40_p7 = scmp.eq.s32.totalorder %s37_s20, 0 }
   0xf   : > { %p887_p8 = por %p56_p5, %p55_p3  ;;  %p113_p10 = scmp.eq.s32.totalorder %s566_s16, 3 }
  0x10   : > { %p891_p9 = por %p107_p6, %p49_p1  ;;  %p614_p12 = scmp.lt.s32.totalorder %s815_s14, 4 }
  0x11   : > { %s1162_s21 = scalar_select %p887_p8, 1, 0 }
  0x12   : > { %s1163_s22 = scalar_select %p891_p9, 1, 0 }
  0x13   : > { %s896_s23 = scalar_select %p40_p7, %s803_s11, %s42_s18  }
  0x14   : > { %p898_p11 = por %p113_p10, %p55_p3  ;;  %s904_s25 = sand.u32 1, %s803_s11  }
  0x15   : > { %s569_s26 = sshll.u32 %s904_s25, 5  ;;  %s586_s27 = sshll.u32 %s811_s13, 9 }
  0x16   : > { %s1164_s24 = scalar_select %p898_p11, 1, 0 }
  0x17   : > { %s913_s30 = scalar_lea.hbm %s1156_s0, %s586_s27  ;;  %s137_s3 = scalar_lea.vmem [#allocation3], %s569_s26 }
  0x18   : > { %s147_s4 = sshll.u32 %s137_s3, 4  ;;  %p921_p13 = pnand %p614_p12, %p881_p4  ;;  %s917_s4 = int_to_ptr.vmem [resolvable:$true] %s147_s4 }
  0x19   : > { %s134_s6 = scalar_lea.sflag [#allocation4], %s904_s25  ;;  %s669_s7 = scalar_lea.hbm %s913_s30, 512 }
  0x1a   : > { %p670_p1 = scmp.ne.s32.totalorder %s913_s30, %s669_s7  ;;  %p671_p2 = pneg %p921_p13 }
  0x1b   : > { %s674_s16 = scalar_lea.hbm %s1156_s0, 2048  ;;  %p675_p4 = scmp.lt.u32.totalorder %s913_s30, %s1156_s0 }
  0x1c   : > { %p672_p3 = pnand %p671_p2, %p670_p1  ;;  %p676_p6 = scmp.lt.u32.totalorder %s674_s16, %s669_s7 }
  0x1d   : > { %p678_p10 = scmp.lt.u32.totalorder %s669_s7, %s913_s30 }
  0x1e   : > { %p673_p5 = pneg %p672_p3  ;;  %p677_p7 = por %p676_p6, %p675_p4 }
  0x20   : > { %p679_p12 = por %p678_p10, %p677_p7 }
  0x22   : > { %p680_p0 = pnand %p679_p12, %p673_p5 }
  0x24   : > { %683 = shalt.err (!%p680_p0)
}
  0x25   : > { %s684_s20 = scalar_lea.vmem %s917_s4, 512  ;;  %s817_s28 = smov [#allocation3]  }
  0x26   : > { %p685_p1 = scmp.ne.s32.totalorder %s917_s4, %s684_s20  ;;  %s689_s29 = sshll.u32 %s817_s28, 4  ;;  %s690_s29 = int_to_ptr.vmem [resolvable:$false] %s689_s29 }
  0x27   : > { %s691_s3 = scalar_lea.vmem %s690_s29, 1024  ;;  %p692_p9 = scmp.lt.s32.totalorder %s917_s4, %s690_s29 }
  0x28   : > { %p687_p3 = pnand %p685_p1, %p671_p2  ;;  %p693_p4 = scmp.lt.s32.totalorder %s691_s3, %s684_s20 }
  0x2a   : > { %p688_p11 = pneg %p687_p3  ;;  %p694_p6 = por %p693_p4, %p692_p9 }
  0x2c   : > { %p695_p7 = pnand %p694_p6, %p688_p11 }
  0x2e   : > { %698 = shalt.err (!%p695_p7)
}
  0x2f   : > { %s818_s7 = smov 128   ;;  %s819_s8 = smov 8  }
  0x30   : > { %606 = dma.hbm_to_vmem [thread:$0]  (!%p921_p13), %s913_s30, 512, %s917_s4, %s134_s6, %s818_s7, %s818_s7, %s819_s8  }
  0x31   : > { %p179_p9 = scmp.lt.s32.totalorder %s815_s14, 5  ;;  %s963_s18 = scalar_lea.hbm %s1157_s1, %s586_s27 }
  0x32   : > { %p1166_p11 = scmp.ge.s32.totalorder %s815_s14, 1  ;;  %s161_s20 = scalar_lea.vmem [#allocation6], %s569_s26 }
  0x33   : > { %s171_s28 = sshll.u32 %s161_s20, 4  ;;  %s158_s30 = scalar_lea.sflag [#allocation7], %s904_s25  ;;  %s973_s28 = int_to_ptr.vmem [resolvable:$true] %s171_s28 }
  0x34   : > { %p967_p0 = pnand %p1166_p11, %p179_p9  ;;  %s699_s4 = scalar_lea.hbm %s963_s18, 512 }
  0x35   : > { %p700_p5 = scmp.ne.s32.totalorder %s963_s18, %s699_s4  ;;  %s704_s29 = scalar_lea.hbm %s1157_s1, 2048 }
  0x36   : > { %p705_p1 = scmp.lt.u32.totalorder %s963_s18, %s1157_s1  ;;  %p706_p3 = scmp.lt.u32.totalorder %s704_s29, %s699_s4 }
  0x37   : > { %p702_p10 = pnand %p700_p5, %p671_p2  ;;  %p708_p6 = scmp.lt.u32.totalorder %s699_s4, %s963_s18 }
  0x38   : > { %p707_p4 = por %p706_p3, %p705_p1 }
  0x39   : > { %p703_p12 = pneg %p702_p10 }
  0x3a   : > { %p709_p7 = por %p708_p6, %p707_p4 }
  0x3c   : > { %p710_p9 = pnand %p709_p7, %p703_p12 }
  0x3e   : > { %713 = shalt.err (!%p710_p9)
}
  0x3f   : > { %s714_s26 = scalar_lea.vmem %s973_s28, 512  ;;  %s820_s16 = smov [#allocation6]  }
  0x40   : > { %p715_p11 = scmp.ne.s32.totalorder %s973_s28, %s714_s26  ;;  %s719_s20 = sshll.u32 %s820_s16, 4  ;;  %s720_s20 = int_to_ptr.vmem [resolvable:$false] %s719_s20 }
  0x41   : > { %s721_s27 = scalar_lea.vmem %s720_s20, 1024  ;;  %p722_p8 = scmp.lt.s32.totalorder %s973_s28, %s720_s20 }
  0x42   : > { %p717_p5 = pnand %p715_p11, %p671_p2  ;;  %p723_p1 = scmp.lt.s32.totalorder %s721_s27, %s714_s26 }
  0x44   : > { %p718_p10 = pneg %p717_p5  ;;  %p724_p3 = por %p723_p1, %p722_p8 }
  0x46   : > { %p725_p4 = pnand %p724_p3, %p718_p10 }
  0x48   : > { %728 = shalt.err (!%p725_p4)
}
  0x49   : > { %609 = dma.hbm_to_vmem [thread:$0]  (!%p921_p13), %s963_s18, 512, %s973_s28, %s158_s30, %s818_s7, %s818_s7, %s819_s8  }
  0x4a   : > { %183 = sbr.rel (%p967_p0) target bundleno = 681 (0x2a9), region = 28  ;;  %s1007_s4 = sand.u32 (!%p967_p0), 1, %s799_s10  }
  0x4b   : > { %s578_s6 = sshll.u32 (!%p967_p0), %s1007_s4, 5  ;;  %s186_s29 = scalar_lea.sflag (!%p967_p0), [#allocation4], %s1007_s4 }
  0x4c   : > { %s189_s5 = scalar_lea.vmem (!%p967_p0), [#allocation3], %s578_s6  ;;  %p1168_p8 = scmp.ne.s32.totalorder (!%p967_p0), %s1162_s21, 0 }
  0x51   : > { %782 = dma.done.wait (%p1168_p8), %s186_s29, 512  }
  0x52   : > { %784 = vsyncadd (%p1168_p8), %s186_s29, 4294966784  ;;  %s195_s25 = scalar_lea.sflag [#allocation7], %s1007_s4  ;;  %s198_s7 = scalar_lea.vmem [#allocation6], %s578_s6 }
  0x53   : > { %786 = dma.done.wait (%p1168_p8), %s195_s25, 512  }
  0x54   : > { %788 = vsyncadd (%p1168_p8), %s195_s25, 4294966784  ;;  %v228_v0 = vld [vmem:[%s189_s5] sm:$0xff]  ;;  %v229_v2 = vld [vmem:[%s189_s5 + $0x8] sm:$0xff]  ;;  %s821_s8 = smov 16   ;;  %s822_s21 = smov 15   ;;  %vm281_vm0 = vcmask 1047680  }
  0x55   : > { %v232_v1 = vld [vmem:[%s198_s7] sm:$0xff]  ;;  %v233_v4 = vld [vmem:[%s198_s7 + $0x8] sm:$0xff]  ;;  %v230_v5 = vld [vmem:[%s189_s5 + $0x10] sm:$0xff]  ;;  %s823_s18 = smov 113   ;;  %vm244_vm1 = vcmask 130048   ;;  %vm369_vm2 = vcmask 1040384  }
  0x56   : > { %v1020_v3 = vsub.f32 %v228_v0, %v232_v1  ;;  %v234_v6 = vld [vmem:[%s198_s7 + $0x10] sm:$0xff]  ;;  %v231_v8 = vld [vmem:[%s189_s5 + $0x18] sm:$0xff]  ;;  %v1025_v10 = vsub.f32 %v229_v2, %v233_v4  ;;  %vm392_vm3 = vcmask 1046528   ;;  %vm404_vm5 = vcmask 129024   ;;  %s580_s19 = sshll.u32 %s1007_s4, 3  ;;  %s582_s26 = sshll.u32 %s807_s12, 7 }
  0x57   : > { %v1022_v7 = vsub.f32 %v230_v5, %v234_v6  ;;  %v235_v9 = vld [vmem:[%s198_s7 + $0x18] sm:$0xff]  ;;  %s223_s16 = scalar_lea.vmem [#allocation8], %s580_s19  ;;  %s1108_s29 = scalar_lea.hbm %s1158_s2, %s582_s26 }
  0x58   : > { %282 = vrot.lane.b32.xlu0 %v1020_v3, %s821_s8  ;;  %v1028_v11 = vsub.f32 %v231_v8, %v235_v9  ;;  %v240_v40 = vand.u32 2147483647, %v1020_v3  ;;  %v241_v41 = vand.u32 2147483647, %v1025_v10  ;;  %v261_v48 = vmul.f32 %v1020_v3, %v1020_v3  ;;  %s458_s20 = sshll.u32 %s223_s16, 4  ;;  %s445_s12 = scalar_lea.sflag [#allocation5], %s1007_s4  ;;  %s1110_s20 = int_to_ptr.vmem [resolvable:$true] %s458_s20 }
  0x59   : > { %288 = vrot.lane.b32.xlu1 %v1022_v7, %s821_s8  ;;  %v242_v42 = vand.u32 2147483647, %v1022_v7  ;;  %v262_v49 = vmul.f32 %v1025_v10, %v1025_v10  ;;  %v263_v52 = vmul.f32 %v1022_v7, %v1022_v7  ;;  %v370_v62 = vrot.slane %v1020_v3, 7  ;;  %s729_s5 = scalar_lea.vmem %s1110_s20, 128  ;;  %p1169_p2 = scmp.ne.s32.totalorder %s1163_s22, 0 }
  0x5a   : > { %v245_v43 = vsel %vm244_vm1, %v240_v40, 0.0  ;;  %v246_v44 = vsel %vm244_vm1, %v241_v41, 0.0  ;;  %v243_v46 = vand.u32 2147483647, %v1028_v11  ;;  %v265_v53 = vsel %vm244_vm1, %v261_v48, 0.0  ;;  %p730_p13 = scmp.ne.s32.totalorder %s1110_s20, %s729_s5  ;;  %s824_s25 = smov [#allocation8]  }
  0x5b   : > { %v247_v45 = vadd.f32 %v246_v44, %v245_v43  ;;  %v248_v47 = vsel %vm244_vm1, %v242_v42, 0.0  ;;  %v266_v54 = vsel %vm244_vm1, %v262_v49, 0.0  ;;  %v264_v57 = vmul.f32 %v1028_v11, %v1028_v11  ;;  %s733_s7 = sshll.u32 %s824_s25, 4  ;;  %s734_s7 = int_to_ptr.vmem [resolvable:$false] %s733_s7 }
  0x5c   : > { %285 = vrot.lane.b32.xlu0 %v1025_v10, %s821_s8  ;;  %v250_v51 = vsel %vm244_vm1, %v243_v46, 0.0  ;;  %v267_v56 = vadd.f32 %v266_v54, %v265_v53  ;;  %v268_v58 = vsel %vm244_vm1, %v263_v52, 0.0  ;;  %v371_v63 = vrot.slane %v1025_v10, 7  ;;  %p731_p0 = pnand %p730_p13, %p1169_p2  ;;  %p736_p6 = scmp.lt.s32.totalorder %s1110_s20, %s734_s7 }
  0x5d   : > { %291 = vrot.lane.b32.xlu1 %v1028_v11, %s821_s8  ;;  %v249_v50 = vadd.f32 %v248_v47, %v247_v45  ;;  %v270_v60 = vsel %vm244_vm1, %v264_v57, 0.0  ;;  %v373_v1 = vrot.slane %v1022_v7, 7  ;;  %v374_v2 = vrot.slane %v1028_v11, 7 }
  0x5e   : > { %v269_v59 = vadd.f32 %v268_v58, %v267_v56  ;;  %v372_v0 = vsel %vm369_vm2, %v370_v62, %v371_v63  ;;  %v380_v4 = vsub.f32 %v1020_v3, %v370_v62  ;;  %v306_v8 = vlaneseq  ;;  %p732_p12 = pneg %p731_p0 }
  0x5f   : > { %v251_v55 = vadd.f32 %v250_v51, %v249_v50  ;;  %v381_v5 = vsub.f32 %v1025_v10, %v372_v0  ;;  %v375_v6 = vsel %vm369_vm2, %v373_v1, %v374_v2  ;;  %v382_v9 = vsub.f32 %v1022_v7, %v373_v1 }
  0x60   : > { %313 = vrot.lane.b32.xlu0 %v1020_v3, %s822_s21  ;;  %v271_v61 = vadd.f32 %v270_v60, %v269_v59 }
  0x61   : > { %315 = vrot.lane.b32.xlu1 %v1025_v10, %s822_s21 }
  0xca   : > { %v283_v12 = vpop.permute.xlu0 %282 }
  0xcb   : > { %v284_v13 = vsel %vm281_vm0, %v283_v12, %v1020_v3  ;;  %v289_v14 = vpop.permute.xlu1 %288  ;;  %v383_v12 = vsub.f32 %v1028_v11, %v375_v6 }
  0xcc   : > { %294 = vrot.lane.b32.xlu0 %v284_v13, %s821_s8  ;;  %v290_v15 = vsel %vm281_vm0, %v289_v14, %v1022_v7  ;;  %v384_v13 = vand.u32 2147483647, %v380_v4  ;;  %v385_v14 = vand.u32 2147483647, %v381_v5 }
  0xce   : > { %v286_v16 = vpop.permute.xlu0 %285 }
  0xcf   : > { %v287_v17 = vsel %vm281_vm0, %v286_v16, %v1025_v10  ;;  %v292_v18 = vpop.permute.xlu1 %291  ;;  %v386_v16 = vand.u32 2147483647, %v382_v9 }
  0xd0   : > { %296 = vrot.lane.b32.xlu1 %v287_v17, %s821_s8  ;;  %298 = vrot.lane.b32.xlu0 %v290_v15, %s821_s8  ;;  %v293_v19 = vsel %vm281_vm0, %v292_v18, %v1028_v11  ;;  %v1080_v15 = vand.u32 127, %v306_v8  ;;  %v387_v17 = vand.u32 2147483647, %v383_v12  ;;  %v393_v18 = vrot.slane %v384_v13, 1 }
  0xd2   : > { %v314_v20 = vpop.permute.xlu0 %313  ;;  %vm308_vm4 = vcmp.ge.s32.totalorder %v1080_v15, 1  ;;  %vm423_vm6 = vcmp.eq.s32.totalorder %v1080_v15, 3  ;;  %vm422_vm7 = vcmp.eq.s32.totalorder %v1080_v15, 2  ;;  %vm421_vm8 = vcmp.eq.s32.totalorder %v1080_v15, 1 }
  0xd3   : > { %v316_v21 = vpop.permute.xlu1 %315  ;;  %vm420_vm9 = vcmp.eq.s32.totalorder %v1080_v15, 0 }
  0xd4   : > { %317 = vrot.lane.b32.xlu1 %v1022_v7, %s822_s21  ;;  %300 = vrot.lane.b32.xlu0 %v293_v19, %s821_s8  ;;  %v394_v19 = vrot.slane %v385_v14, 1  ;;  %s735_s8 = scalar_lea.vmem %s734_s7, 256 }
  0xd5   : > { %p737_p7 = scmp.lt.s32.totalorder %s735_s8, %s729_s5 }
  0xd7   : > { %p738_p9 = por %p737_p7, %p736_p6 }
  0xd8   : > { %319 = vrot.lane.b32.xlu1 %v1028_v11, %s822_s21 }
  0xd9   : > { %p739_p11 = pnand %p738_p9, %p732_p12 }
 0x13e   : > { %v295_v22 = vpop.permute.xlu0 %294 }
 0x13f   : > { %v302_v23 = vsel %vm281_vm0, %v295_v22, %v1020_v3 }
 0x140   : > { %v325_v24 = vsub.f32 %v302_v23, %v314_v20  ;;  %v395_v20 = vsel %vm392_vm3, %v393_v18, %v394_v19 }
 0x141   : > { %v403_v23 = vsel %vm244_vm1, %v395_v20, 0.0 }
 0x142   : > { %v329_v25 = vand.u32 2147483647, %v325_v24  ;;  %v297_v26 = vpop.permute.xlu1 %296  ;;  %v299_v27 = vpop.permute.xlu0 %298  ;;  %v405_v24 = vsel %vm404_vm5, %v394_v19, 0.0 }
 0x143   : > { %v303_v28 = vsel %vm281_vm0, %v297_v26, %v1025_v10  ;;  %v304_v30 = vsel %vm281_vm0, %v299_v27, %v1022_v7  ;;  %v396_v10 = vrot.slane %v386_v16, 1 }
 0x144   : > { %v326_v29 = vsub.f32 %v303_v28, %v316_v21  ;;  %337 = vrot.lane.b32.xlu0 %v329_v25, %s823_s18  ;;  %v397_v21 = vrot.slane %v387_v17, 1 }
 0x146   : > { %v330_v31 = vand.u32 2147483647, %v326_v29  ;;  %v318_v32 = vpop.permute.xlu1 %317  ;;  %v301_v33 = vpop.permute.xlu0 %300  ;;  %v398_v26 = vsel %vm392_vm3, %v396_v10, %v397_v21 }
 0x147   : > { %v327_v34 = vsub.f32 %v304_v30, %v318_v32  ;;  %v305_v35 = vsel %vm281_vm0, %v301_v33, %v1028_v11  ;;  %v407_v33 = vsel %vm244_vm1, %v398_v26, 0.0 }
 0x148   : > { %339 = vrot.lane.b32.xlu1 %v330_v31, %s823_s18  ;;  %v406_v31 = vadd.f32 %v405_v24, %v403_v23 }
 0x149   : > { %v331_v36 = vand.u32 2147483647, %v327_v34 }
 0x14a   : > { %v320_v37 = vpop.permute.xlu1 %319 }
 0x14b   : > { %v328_v38 = vsub.f32 %v305_v35, %v320_v37  ;;  %341 = vrot.lane.b32.xlu0 %v331_v36, %s823_s18  ;;  %v408_v37 = vadd.f32 %v407_v33, %v406_v31 }
 0x14d   : > { %v332_v39 = vand.u32 2147483647, %v328_v38 }
 0x14f   : > { %343 = vrot.lane.b32.xlu1 %v332_v39, %s823_s18  ;;  %v409_v39 = vsel %vm404_vm5, %v397_v21, 0.0 }
 0x150   : > { %v410_v41 = vadd.f32 %v409_v39, %v408_v37 }
 0x16a   : > { %252 = vadd.xlane.f32.xlu0 %v251_v55 }
 0x173   : > { %272 = vadd.xlane.f32.xlu1 %v271_v61 }
 0x1b6   : > { %v338_v3 = vpop.permute.xlu0 %337 }
 0x1b7   : > { %v349_v7 = vsel %vm308_vm4, %v338_v3, 0.0 }
 0x1b8   : > { %v353_v27 = vsel %vm244_vm1, %v349_v7, 0.0 }
 0x1ba   : > { %v340_v11 = vpop.permute.xlu1 %339 }
 0x1bb   : > { %v350_v22 = vsel %vm308_vm4, %v340_v11, 0.0 }
 0x1bc   : > { %v354_v25 = vsel %vm244_vm1, %v350_v22, 0.0 }
 0x1bd   : > { %v342_v28 = vpop.permute.xlu0 %341  ;;  %v355_v29 = vadd.f32 %v354_v25, %v353_v27 }
 0x1be   : > { %v351_v30 = vsel %vm308_vm4, %v342_v28, 0.0 }
 0x1bf   : > { %v356_v32 = vsel %vm244_vm1, %v351_v30, 0.0 }
 0x1c0   : > { %v357_v35 = vadd.f32 %v356_v32, %v355_v29 }
 0x1c1   : > { %v344_v34 = vpop.permute.xlu1 %343 }
 0x1c2   : > { %v352_v36 = vsel %vm308_vm4, %v344_v34, 0.0 }
 0x1c3   : > { %v358_v38 = vsel %vm244_vm1, %v352_v36, 0.0 }
 0x1c4   : > { %v359_v40 = vadd.f32 %v358_v38, %v357_v35 }
 0x1c6   : > { %360 = vadd.xlane.f32.xlu0 %v359_v40 }
 0x1ca   : > { %411 = vadd.xlane.f32.xlu0 %v410_v41 }
 0x1f7   : > { %v253_v42 = vpop.xlane.xlu0 %252 }
 0x1f8   : > { %v254_v43 = vrot.slane %v253_v42, 4 }
 0x1fa   : > { %v255_v44 = vadd.f32 %v254_v43, %v253_v42 }
 0x1fc   : > { %v256_v45 = vrot.slane %v255_v44, 2 }
 0x1fe   : > { %v257_v46 = vadd.f32 %v256_v45, %v255_v44 }
 0x200   : > { %v273_v47 = vpop.xlane.xlu1 %272  ;;  %v258_v48 = vrot.slane %v257_v46, 1 }
 0x201   : > { %v274_v49 = vrot.slane %v273_v47, 4 }
 0x202   : > { %v259_v50 = vadd.f32 %v258_v48, %v257_v46 }
 0x203   : > { %v275_v51 = vadd.f32 %v274_v49, %v273_v47 }
 0x204   : > { %589 = vpush %v259_v50 }
 0x205   : > { %v276_v52 = vrot.slane %v275_v51, 2 }
 0x207   : > { %v277_v53 = vadd.f32 %v276_v52, %v275_v51 }
 0x209   : > { %v278_v54 = vrot.slane %v277_v53, 1 }
 0x20b   : > { %v279_v55 = vadd.f32 %v278_v54, %v277_v53 }
 0x20d   : > { %591 = vpush %v279_v55 }
 0x235   : > { %s590_s28 = spop %589 }
 0x236   : > { %v430_v16 = vstv %s590_s28 }
 0x23e   : > { %s592_s30 = spop %591 }
 0x23f   : > { %v428_v13 = vstv %s592_s30 }
 0x253   : > { %v361_v56 = vpop.xlane.xlu0 %360 }
 0x254   : > { %v362_v57 = vrot.slane %v361_v56, 4 }
 0x256   : > { %v363_v58 = vadd.f32 %v362_v57, %v361_v56 }
 0x257   : > { %v412_v59 = vpop.xlane.xlu0 %411 }
 0x258   : > { %v364_v60 = vrot.slane %v363_v58, 2  ;;  %v413_v61 = vrot.slane %v412_v59, 4 }
 0x25a   : > { %v414_v62 = vadd.f32 %v413_v61, %v412_v59  ;;  %v365_v63 = vadd.f32 %v364_v60, %v363_v58 }
 0x25c   : > { %v415_v0 = vrot.slane %v414_v62, 2  ;;  %v366_v1 = vrot.slane %v365_v63, 1 }
 0x25e   : > { %v416_v2 = vadd.f32 %v415_v0, %v414_v62  ;;  %v367_v4 = vadd.f32 %v366_v1, %v365_v63 }
 0x260   : > { %593 = vpush %v367_v4  ;;  %v417_v5 = vrot.slane %v416_v2, 1 }
 0x262   : > { %v418_v6 = vadd.f32 %v417_v5, %v416_v2 }
 0x264   : > { %595 = vpush %v418_v6 }
 0x291   : > { %s594_s3 = spop %593 }
 0x292   : > { %v426_v9 = vstv %s594_s3 }
 0x295   : > { %s596_s15 = spop %595 }
 0x296   : > { %v424_v8 = vstv %s596_s15 }
 0x297   : > { %v425_v12 = vsel %vm423_vm6, %v424_v8, 0.0 }
 0x298   : > { %v427_v14 = vsel %vm422_vm7, %v426_v9, %v425_v12 }
 0x299   : > { %v429_v17 = vsel %vm421_vm8, %v428_v13, %v427_v14 }
 0x29a   : > { %v431_v18 = vsel %vm420_vm9, %v430_v16, %v429_v17 }
 0x29b   : > { %436 = vst [vmem:[%s223_s16] sm:$0xff] %v431_v18 }
 0x29c   : > { %742 = shalt.err (!%p739_p11)
}
 0x29d   : > { %s743_s4 = scalar_lea.hbm %s1108_s29, 128  ;;  %s747_s19 = scalar_lea.hbm %s1158_s2, 512 }
 0x29e   : > { %p744_p5 = scmp.ne.s32.totalorder %s1108_s29, %s743_s4  ;;  %p748_p3 = scmp.lt.u32.totalorder %s1108_s29, %s1158_s2 }
 0x29f   : > { %p749_p4 = scmp.lt.u32.totalorder %s747_s19, %s743_s4  ;;  %p751_p13 = scmp.lt.u32.totalorder %s743_s4, %s1108_s29 }
 0x2a0   : > { %p745_p10 = pnand %p744_p5, %p1169_p2 }
 0x2a1   : > { %p750_p8 = por %p749_p4, %p748_p3 }
 0x2a2   : > { %p746_p1 = pneg %p745_p10 }
 0x2a3   : > { %p752_p0 = por %p751_p13, %p750_p8 }
 0x2a5   : > { %p753_p12 = pnand %p752_p0, %p746_p1 }
 0x2a7   : > { %756 = shalt.err (!%p753_p12)
}
 0x2a8   : > { %601 = dma.vmem_to_hbm [thread:$0]  (%p1169_p2), %s1110_s20, 128, %s1108_s29, %s445_s12  }
 0x2a9 PF: > { %p615_p6 = scmp.ge.s32.totalorder %s815_s14, 2  ;;  %s470_s3 = sand.u32 1, %s795_s9  }
 0x2aa   : > { %p1170_p7 = scmp.ne.s32.totalorder %s1164_s24, 0  ;;  %s471_s15 = scalar_lea.sflag [#allocation5], %s470_s3 }
 0x2ac   : > { %p611_p9 = pnand %p615_p6, %p1170_p7 }
 0x2ae   : > { %790 = dma.done.wait (!%p611_p9), %s471_s15, 128  }
 0x2af   : > { %792 = vsyncadd (!%p611_p9), %s471_s15, 4294967168  ;;  %s21_s14 = sadd.s32 1, %s815_s14   ;;  %s1171_s9 = smov %s799_s10 }
 0x2b0   : > { %p18_p11 = scmp.ge.s32.totalorder %s21_s14, 6   ;;  %s1172_s10 = smov %s803_s11 }
 0x2b1   : > { %s1173_s11 = smov %s896_s23  ;;  %s1174_s12 = smov %s811_s13 }
 0x2b2   : > { %s1175_s13 = smov %s1177_s17  ;;  %20 = sbr.rel (!%p18_p11) target bundleno = 8 (0x8), region = 94 }
 0x2b9   :  { %476 = vsyncpa [#allocation4], 1 }
 0x2ba   :  { %478 = vsyncpa [#allocation4 + $0x1], 1 }
 0x2bb   :  { %479 = vsyncpa [#allocation7], 1 }
 0x2bc   :  { %481 = vsyncpa [#allocation7 + $0x1], 1 }
 0x2bd   :  { %482 = vsyncpa [#allocation5], 1 }
 0x2be   :  { %484 = vsyncpa [#allocation5 + $0x1], 1 }

</bundles_post_ra>
